<compile_context>
chip_gen: v6e
topology: v6e:2x2x1
jax: 0.10.0
libtpu: 0.0.40
codegen_flags: <defaults>
</compile_context>

<pallas_src>
import jax
import jax.numpy as jnp
from jax.experimental import pallas as pl
from jax.experimental.pallas import tpu as pltpu


def _default_vmem_limit():
    """cap/2 scoped VMEM: ~64 MiB on v5e/v6e (128 MiB phys), ~32 MiB on v7x."""
    try:
        info = pltpu.get_tpu_info()
        cap = getattr(info, "vmem_capacity_bytes", None)
        if cap:
            return int(max(32 * 1024 * 1024, min(100 * 1024 * 1024, cap // 2)))
    except Exception:
        pass
    return 32 * 1024 * 1024


_VMEM_LIMIT = _default_vmem_limit()


def _tile(dim, target, align):
    """Largest multiple of `align` <= target that divides dim, else full dim.

    TODO(synk): for large, oddly-factored M=B*S this falls back to a single
    full-dim tile (no pipelining); pad M in the caller if that ever happens.
    """
    if dim <= target:
        return dim
    t = (target // align) * align
    while t >= align:
        if dim % t == 0:
            return t
        t -= align
    return dim


# ----------------------------------------------------------------------------
# Tiled linear:  o = act(x @ W + b)   (bf16 in / bf16 out, f32 MXU accumulator)
# ----------------------------------------------------------------------------
def _linear_kernel(activation):
    def kernel(x_ref, w_ref, b_ref, o_ref, acc_ref):
        @pl.when(pl.program_id(2) == 0)
        def _():
            acc_ref[...] = jnp.zeros_like(acc_ref)

        acc_ref[...] += jnp.dot(x_ref[...], w_ref[...],
                                preferred_element_type=jnp.float32)

        @pl.when(pl.program_id(2) == pl.num_programs(2) - 1)
        def _():
            y = acc_ref[...] + b_ref[...]
            if activation == "gelu":
                # TODO(synk): tanh-approx GELU; switch to erf form if lpzero's
                # block uses exact nn.GELU.
                y = 0.5 * y * (1.0 + jnp.tanh(
                    0.7978845608028654 * (y + 0.044715 * y * y * y)))
            elif activation == "tanh":
                y = jnp.tanh(y)
            o_ref[...] = y.astype(o_ref.dtype)

    return kernel


def pallas_linear(x, w, b, activation=None, *, tm=512, tn=512, tk=512):
    """x: (M, K) bf16, w: (K, N) bf16, b: (1, N) f32 -> (M, N) bf16."""
    M, K = x.shape
    N = w.shape[1]
    tm = _tile(M, tm, 8)
    tn = _tile(N, tn, 128)
    tk = _tile(K, tk, 128)
    grid = (M // tm, N // tn, K // tk)
    return pl.pallas_call(
        _linear_kernel(activation),
        out_shape=jax.ShapeDtypeStruct((M, N), jnp.bfloat16),
        grid=grid,
        in_specs=[
            pl.BlockSpec((tm, tk), lambda i, j, k: (i, k)),
            pl.BlockSpec((tk, tn), lambda i, j, k: (k, j)),
            pl.BlockSpec((1, tn), lambda i, j, k: (0, j)),
        ],
        out_specs=pl.BlockSpec((tm, tn), lambda i, j, k: (i, j)),
        scratch_shapes=[pltpu.VMEM((tm, tn), jnp.float32)],
        compiler_params=pltpu.CompilerParams(
            dimension_semantics=("parallel", "parallel", "arbitrary"),
            vmem_limit_bytes=_VMEM_LIMIT),
    )(x, w, b)


# ----------------------------------------------------------------------------
# Tiled linear fused with residual add + LayerNorm epilogue:
#   o = LayerNorm(x @ W + b + residual)        (N kept full-width for the LN)
# ----------------------------------------------------------------------------
def _linear_res_ln_kernel(eps):
    def kernel(x_ref, w_ref, b_ref, res_ref, g_ref, beta_ref, o_ref, acc_ref):
        @pl.when(pl.program_id(1) == 0)
        def _():
            acc_ref[...] = jnp.zeros_like(acc_ref)

        acc_ref[...] += jnp.dot(x_ref[...], w_ref[...],
                                preferred_element_type=jnp.float32)

        @pl.when(pl.program_id(1) == pl.num_programs(1) - 1)
        def _():
            h = acc_ref[...] + b_ref[...] + res_ref[...].astype(jnp.float32)
            mu = jnp.mean(h, axis=-1, keepdims=True)
            var = jnp.mean(jnp.square(h - mu), axis=-1, keepdims=True)
            normed = (h - mu) * jax.lax.rsqrt(var + eps)
            o_ref[...] = (normed * g_ref[...] + beta_ref[...]).astype(o_ref.dtype)

    return kernel


def pallas_linear_residual_ln(x, w, b, residual, gamma, beta, eps=1e-5,
                              *, tm=512, tk=512):
    """x: (M, K) bf16, w: (K, N) bf16, residual: (M, N) bf16 -> (M, N) bf16."""
    M, K = x.shape
    N = w.shape[1]
    tm = _tile(M, tm, 8)
    tk = _tile(K, tk, 128)
    grid = (M // tm, K // tk)
    return pl.pallas_call(
        _linear_res_ln_kernel(eps),
        out_shape=jax.ShapeDtypeStruct((M, N), jnp.bfloat16),
        grid=grid,
        in_specs=[
            pl.BlockSpec((tm, tk), lambda i, k: (i, k)),
            pl.BlockSpec((tk, N), lambda i, k: (k, 0)),
            pl.BlockSpec((1, N), lambda i, k: (0, 0)),
            pl.BlockSpec((tm, N), lambda i, k: (i, 0)),
            pl.BlockSpec((1, N), lambda i, k: (0, 0)),
            pl.BlockSpec((1, N), lambda i, k: (0, 0)),
        ],
        out_specs=pl.BlockSpec((tm, N), lambda i, k: (i, 0)),
        scratch_shapes=[pltpu.VMEM((tm, N), jnp.float32)],
        compiler_params=pltpu.CompilerParams(
            dimension_semantics=("parallel", "arbitrary"),
            vmem_limit_bytes=_VMEM_LIMIT),
    )(x, w, b, residual, gamma, beta)


# ----------------------------------------------------------------------------
# Embedding add + LayerNorm (tiled over rows).  bf16 in / bf16 out, f32 math.
# ----------------------------------------------------------------------------
def pallas_add_layernorm(x, y, gamma, beta, eps=1e-5, *, tm=512):
    M, H = x.shape
    tm = _tile(M, tm, 8)

    def kernel(x_ref, y_ref, g_ref, b_ref, o_ref):
        h = x_ref[...].astype(jnp.float32) + y_ref[...].astype(jnp.float32)
        mu = jnp.mean(h, axis=-1, keepdims=True)
        var = jnp.mean(jnp.square(h - mu), axis=-1, keepdims=True)
        normed = (h - mu) * jax.lax.rsqrt(var + eps)
        o_ref[...] = (normed * g_ref[...] + b_ref[...]).astype(o_ref.dtype)

    return pl.pallas_call(
        kernel,
        out_shape=jax.ShapeDtypeStruct((M, H), jnp.bfloat16),
        grid=(M // tm,),
        in_specs=[
            pl.BlockSpec((tm, H), lambda i: (i, 0)),
            pl.BlockSpec((tm, H), lambda i: (i, 0)),
            pl.BlockSpec((1, H), lambda i: (0, 0)),
            pl.BlockSpec((1, H), lambda i: (0, 0)),
        ],
        out_specs=pl.BlockSpec((tm, H), lambda i: (i, 0)),
        compiler_params=pltpu.CompilerParams(
            dimension_semantics=("parallel",),
            vmem_limit_bytes=_VMEM_LIMIT),
    )(x, y, gamma, beta)


# ----------------------------------------------------------------------------
# Multi-head attention on the fused, lane-dense (B, S, 3H) qkv tensor.
#   * grid = (B, S // tq): query-tiled so the per-head score temp is (tq, S).
#   * qkv block index is constant across the q-tile axis -> fetched once/batch.
#   * per-head q/k/v are static-offset slices of the VMEM-resident qkv block
#     (no XLA slice copies, no jnp.concatenate of per-head contexts).
# TODO(synk): with Dh=64 the QK^T / P.V matmuls underfill the 256-wide MXU on
#             v6e/v7x; head-pairing the P.V matmul would raise utilization.
# ----------------------------------------------------------------------------
def pallas_attention(qkv, bias, num_heads, *, tq=256):
    """qkv: (B, S, 3H) bf16; bias: (B, 1, S) f32 additive mask -> (B, S, H) bf16."""
    B, S, H3 = qkv.shape
    H = H3 // 3
    Dh = H // num_heads
    tq = _tile(S, tq, 8)
    scale = 1.0 / float(Dh) ** 0.5
    contract_last = (((1,), (1,)), ((), ()))

    def kernel(qkv_ref, m_ref, o_ref):
        q0 = pl.multiple_of(pl.program_id(1) * tq, tq)
        # Hoist the (1, S) -> (tq, S) bias broadcast out of the head loop.
        bias_b = jnp.broadcast_to(m_ref[0], (tq, S))
        for h in range(num_heads):
            qh = qkv_ref[0, pl.ds(q0, tq), pl.ds(h * Dh, Dh)]       # (tq, Dh) bf16
            kh = qkv_ref[0, :, pl.ds(H + h * Dh, Dh)]               # (S,  Dh) bf16
            vh = qkv_ref[0, :, pl.ds(2 * H + h * Dh, Dh)]           # (S,  Dh) bf16
            scores = jax.lax.dot_general(
                qh, kh, contract_last,
                preferred_element_type=jnp.float32) * scale + bias_b  # (tq, S) f32
            smax = jnp.max(scores, axis=-1, keepdims=True)
            p = jnp.exp(scores - smax)
            denom = jnp.sum(p, axis=-1, keepdims=True)
            p = p * pl.reciprocal(denom, approx=True)
            ctx = jnp.dot(p.astype(jnp.bfloat16), vh,
                          preferred_element_type=jnp.float32)         # (tq, Dh)
            o_ref[0, :, pl.ds(h * Dh, Dh)] = ctx.astype(o_ref.dtype)

    return pl.pallas_call(
        kernel,
        out_shape=jax.ShapeDtypeStruct((B, S, H), jnp.bfloat16),
        grid=(B, S // tq),
        in_specs=[
            pl.BlockSpec((1, S, H3), lambda b, qi: (b, 0, 0)),
            pl.BlockSpec((1, 1, S), lambda b, qi: (b, 0, 0)),
        ],
        out_specs=pl.BlockSpec((1, tq, H), lambda b, qi: (b, qi, 0)),
        compiler_params=pltpu.CompilerParams(
            dimension_semantics=("parallel", "parallel"),
            vmem_limit_bytes=_VMEM_LIMIT),
    )(qkv, bias)


# ----------------------------------------------------------------------------
# Parameter init (matches Roberta._init_weights: normal(0, 0.02), zero bias,
# LayerNorm gamma=1 / beta=0).  MXU weights and embedding tables in bf16.
# ----------------------------------------------------------------------------
def init_params(key, cfg):
    H, F = cfg["hidden"], cfg["ffn"]
    n_keys = 4 + 4 * cfg["num_layers"]
    keys = iter(jax.random.split(key, n_keys))

    def normal(shape, dtype=jnp.float32):
        return (0.02 * jax.random.normal(next(keys), shape)).astype(dtype)

    ones = lambda n: jnp.ones((1, n), jnp.float32)
    zeros = lambda n: jnp.zeros((1, n), jnp.float32)

    params = {
        "tok_emb": normal((cfg["vocab_size"], H), jnp.bfloat16),
        "pos_emb": normal((cfg["position_size"], H), jnp.bfloat16),
        "emb_ln_g": ones(H),
        "emb_ln_b": zeros(H),
        "layers": [],
    }
    for _ in range(cfg["num_layers"]):
        params["layers"].append({
            # fused Q|K|V projection
            "wqkv": normal((H, 3 * H), jnp.bfloat16), "bqkv": zeros(3 * H),
            "wo": normal((H, H), jnp.bfloat16), "bo": zeros(H),
            "ln1_g": ones(H), "ln1_b": zeros(H),
            "w1": normal((H, F), jnp.bfloat16), "b1": zeros(F),
            "w2": normal((F, H), jnp.bfloat16), "b2": zeros(H),
            "ln2_g": ones(H), "ln2_b": zeros(H),
        })
    params["pool_w"] = normal((H, H))
    params["pool_b"] = zeros(H)
    params["cls_w"] = normal((H, cfg["num_classes"]))
    params["cls_b"] = zeros(cfg["num_classes"])
    return params


# ----------------------------------------------------------------------------
# Forward pass (GLUE task branch, eval mode)
# ----------------------------------------------------------------------------
def roberta_forward(params, token_ids, segment_ids, position_ids, attn_mask, cfg):
    del segment_ids  # unused by Roberta.forward
    B, S = token_ids.shape
    H = cfg["hidden"]
    nH = cfg["num_heads"]

    # --- RobertaEmbedding: bf16 gathers (glue); add + LayerNorm is a kernel.
    # TODO(synk): fuse the gathers into the add+LN kernel via scalar-prefetch
    #             row DMA to also save the two (B*S,H) HBM round-trips.
    tok = jnp.take(params["tok_emb"], token_ids, axis=0).reshape(B * S, H)
    pos = jnp.take(params["pos_emb"], position_ids, axis=0).reshape(B * S, H)
    x = pallas_add_layernorm(tok, pos, params["emb_ln_g"], params["emb_ln_b"])
    # dropout: identity in eval mode

    # additive mask bias, hoisted out of the per-layer / per-head path
    bias = (1.0 - attn_mask.astype(jnp.float32)).reshape(B, 1, S) * (-10000.0)

    # --- Encoder: num_layers x (post-LN) BERT transformer block
    for layer in params["layers"]:
        qkv = pallas_linear(x, layer["wqkv"], layer["bqkv"])       # (B*S, 3H) bf16
        qkv = qkv.reshape(B, S, 3 * H)                             # free reshape
        ctx = pallas_attention(qkv, bias, nH).reshape(B * S, H)
        # attn output projection fused with residual + LayerNorm
        x = pallas_linear_residual_ln(ctx, layer["wo"], layer["bo"],
                                      x, layer["ln1_g"], layer["ln1_b"])
        h = pallas_linear(x, layer["w1"], layer["b1"], activation="gelu")
        # FFN down-projection fused with residual + LayerNorm
        x = pallas_linear_residual_ln(h, layer["w2"], layer["b2"],
                                      x, layer["ln2_g"], layer["ln2_b"])

    # --- Pooler + classifier: tiny (M=B, N<=H) matmuls -> plain JAX
    #     (kernel launch/pipeline overhead would exceed compute).
    cls = x.reshape(B, S, H)[:, 0].astype(jnp.float32)              # (B, H)
    pooled = jnp.tanh(cls @ params["pool_w"] + params["pool_b"])
    logits = pooled @ params["cls_w"] + params["cls_b"]             # (B, C)
    if logits.shape[-1] == 1:  # torch .squeeze(-1) semantics
        logits = jnp.squeeze(logits, axis=-1)
    return logits


# ----------------------------------------------------------------------------
if __name__ == "__main__":
    cfg = dict(
        vocab_size=100,
        position_size=40,
        hidden=32,
        num_heads=2,
        ffn=64,
        num_layers=2,
        num_classes=2,   # GLUE-style task
        pad_token_id=1,
    )

    key = jax.random.PRNGKey(0)
    pkey, dkey = jax.random.split(key)
    params = init_params(pkey, cfg)

    B, S = 2, 8
    token_ids = jax.random.randint(dkey, (B, S), 0, cfg["vocab_size"], dtype=jnp.int32)
    segment_ids = jnp.zeros((B, S), jnp.int32)
    position_ids = jnp.broadcast_to(jnp.arange(2, 2 + S, dtype=jnp.int32), (B, S))
    attn_mask = jnp.ones((B, S), jnp.int32).at[1, 6:].set(0)

    logits = roberta_forward(params, token_ids, segment_ids, position_ids, attn_mask, cfg)
    jax.block_until_ready(logits)
    assert logits.shape == (B, cfg["num_classes"])
    assert bool(jnp.all(jnp.isfinite(logits)))
    print("KERNEL_OK")
</pallas_src>

<mosaic_0001>
module attributes {stable_mosaic.version = 11 : i64} {
  func.func @kernel(%arg0: i32, %arg1: memref<16x32xbf16, #tpu.memory_space<vmem>>, %arg2: memref<16x32xbf16, #tpu.memory_space<vmem>>, %arg3: memref<1x32xf32, #tpu.memory_space<vmem>>, %arg4: memref<1x32xf32, #tpu.memory_space<vmem>>, %arg5: memref<16x32xbf16, #tpu.memory_space<vmem>>) attributes {dimension_semantics = [#tpu.dimension_semantics<parallel>], iteration_bounds = array<i64: 1>, scalar_prefetch = 0 : i64, scratch_operands = 0 : i64, tpu.core_type = #tpu.core_type<tc>, window_params = [{transform_indices = @transform_0, window_bounds = array<i64: 16, 32>}, {transform_indices = @transform_1, window_bounds = array<i64: 16, 32>}, {pipeline_mode = #tpu.pipeline_mode<synchronous>, transform_indices = @transform_2, window_bounds = array<i64: 1, 32>}, {pipeline_mode = #tpu.pipeline_mode<synchronous>, transform_indices = @transform_3, window_bounds = array<i64: 1, 32>}, {transform_indices = @transform_4, window_bounds = array<i64: 16, 32>}]} {
    %c0 = arith.constant 0 : index
    %c0_0 = arith.constant 0 : index
    %0 = vector.load %arg1[%c0, %c0_0] : memref<16x32xbf16, #tpu.memory_space<vmem>>, vector<16x32xbf16>
    %1 = arith.extf %0 : vector<16x32xbf16> to vector<16x32xf32>
    %c0_1 = arith.constant 0 : index
    %c0_2 = arith.constant 0 : index
    %2 = vector.load %arg2[%c0_1, %c0_2] : memref<16x32xbf16, #tpu.memory_space<vmem>>, vector<16x32xbf16>
    %3 = arith.extf %2 : vector<16x32xbf16> to vector<16x32xf32>
    %4 = arith.addf %1, %3 : vector<16x32xf32>
    %cst = arith.constant dense<0.000000e+00> : vector<16xf32>
    %5 = vector.multi_reduction <add>, %4, %cst [1] : vector<16x32xf32> to vector<16xf32>
    %6 = vector.shape_cast %5 : vector<16xf32> to vector<16x1xf32>
    %cst_3 = arith.constant 3.200000e+01 : f32
    %7 = vector.broadcast %cst_3 : f32 to vector<16x1xf32>
    %8 = arith.divf %6, %7 : vector<16x1xf32>
    %9 = vector.broadcast %8 : vector<16x1xf32> to vector<16x32xf32>
    %10 = arith.subf %4, %9 : vector<16x32xf32>
    %11 = arith.mulf %10, %10 : vector<16x32xf32>
    %cst_4 = arith.constant dense<0.000000e+00> : vector<16xf32>
    %12 = vector.multi_reduction <add>, %11, %cst_4 [1] : vector<16x32xf32> to vector<16xf32>
    %13 = vector.shape_cast %12 : vector<16xf32> to vector<16x1xf32>
    %cst_5 = arith.constant 3.200000e+01 : f32
    %14 = vector.broadcast %cst_5 : f32 to vector<16x1xf32>
    %15 = arith.divf %13, %14 : vector<16x1xf32>
    %16 = vector.broadcast %8 : vector<16x1xf32> to vector<16x32xf32>
    %17 = arith.subf %4, %16 : vector<16x32xf32>
    %cst_6 = arith.constant 9.99999974E-6 : f32
    %18 = vector.broadcast %cst_6 : f32 to vector<16x1xf32>
    %19 = arith.addf %15, %18 : vector<16x1xf32>
    %20 = math.rsqrt %19 : vector<16x1xf32>
    %21 = vector.broadcast %20 : vector<16x1xf32> to vector<16x32xf32>
    %22 = arith.mulf %17, %21 : vector<16x32xf32>
    %c0_7 = arith.constant 0 : index
    %c0_8 = arith.constant 0 : index
    %23 = vector.load %arg3[%c0_7, %c0_8] : memref<1x32xf32, #tpu.memory_space<vmem>>, vector<1x32xf32>
    %24 = vector.broadcast %23 : vector<1x32xf32> to vector<16x32xf32>
    %25 = arith.mulf %22, %24 : vector<16x32xf32>
    %c0_9 = arith.constant 0 : index
    %c0_10 = arith.constant 0 : index
    %26 = vector.load %arg4[%c0_9, %c0_10] : memref<1x32xf32, #tpu.memory_space<vmem>>, vector<1x32xf32>
    %27 = vector.broadcast %26 : vector<1x32xf32> to vector<16x32xf32>
    %28 = arith.addf %25, %27 : vector<16x32xf32>
    %29 = arith.truncf %28 : vector<16x32xf32> to vector<16x32xbf16>
    %c0_11 = arith.constant 0 : index
    %c0_12 = arith.constant 0 : index
    %30 = vector.load %arg5[%c0_11, %c0_12] : memref<16x32xbf16, #tpu.memory_space<vmem>>, vector<16x32xbf16>
    tpu.vector_store %arg5[%c0_11, %c0_12], %29 {strides = array<i32>} : memref<16x32xbf16, #tpu.memory_space<vmem>>, vector<16x32xbf16>,
    return
  }
  func.func @transform_0(%arg0: i32) -> (i32, i32) {
    %c0_i32 = arith.constant 0 : i32
    %c0_i32_0 = arith.constant 0 : i32
    return %arg0, %c0_i32 : i32, i32
  }
  func.func @transform_1(%arg0: i32) -> (i32, i32) {
    %c0_i32 = arith.constant 0 : i32
    %c0_i32_0 = arith.constant 0 : i32
    return %arg0, %c0_i32 : i32, i32
  }
  func.func @transform_2(%arg0: i32) -> (i32, i32) {
    %c0_i32 = arith.constant 0 : i32
    %c0_i32_0 = arith.constant 0 : i32
    %c0_i32_1 = arith.constant 0 : i32
    return %c0_i32, %c0_i32_0 : i32, i32
  }
  func.func @transform_3(%arg0: i32) -> (i32, i32) {
    %c0_i32 = arith.constant 0 : i32
    %c0_i32_0 = arith.constant 0 : i32
    %c0_i32_1 = arith.constant 0 : i32
    return %c0_i32, %c0_i32_0 : i32, i32
  }
  func.func @transform_4(%arg0: i32) -> (i32, i32) {
    %c0_i32 = arith.constant 0 : i32
    %c0_i32_0 = arith.constant 0 : i32
    return %arg0, %c0_i32 : i32, i32
  }
}

</mosaic_0001>

<bundles_post_ra>
// kernel: tpu_custom_call.1
= control target key start
LH: loop header
LB: loop body
LE: loop exit
PB: predicated region body
PF: predicated region fallthrough
CT: control target
= control target key end

     0   :  { %9 = vsyncpa [#allocation3], 0  ;;  %s278_s0 = inlined_call_operand.hbm [shape: bf16[16,32], index: 0, kind: input, shape index: {}]   ;;  %s279_s1 = inlined_call_operand.hbm [shape: bf16[16,32], index: 1, kind: input, shape index: {}]   ;;  %s280_s2 = inlined_call_operand.vmem [shape: f32[1,32], index: 2, kind: input, shape index: {}]   ;;  %s281_s3 = inlined_call_operand.vmem [shape: f32[1,32], index: 3, kind: input, shape index: {}]   ;;  %s282_s4 = inlined_call_operand.hbm [shape: bf16[16,32], index: 4, kind: output, shape index: {}]  }
   0x1   :  { %10 = vsyncpa [#allocation6], 0 }
   0x2   :  { %11 = vsyncpa [#allocation4], 0  ;;  %s220_s15 = smov [#allocation2]  }
   0x3   :  { %s17_s16 = sshll.u32 %s220_s15, 4  ;;  %s18_s16 = int_to_ptr.vmem [resolvable:$true] %s17_s16 }
   0x4   :  { %s162_s17 = scalar_lea.vmem %s18_s16, 128  ;;  %p167_p1 = scmp.lt.s32.totalorder %s18_s16, %s18_s16 }
   0x5   :  { %p163_p0 = scmp.ne.s32.totalorder %s18_s16, %s162_s17  ;;  %p168_p2 = scmp.lt.s32.totalorder %s162_s17, %s162_s17 }
   0x7   :  { %p169_p3 = por %p168_p2, %p167_p1 }
   0x9   :  { %p170_p4 = pnand %p169_p3, %p163_p0 }
   0xb   :  { %173 = shalt.err (!%p170_p4)
}
   0xc   :  { %s221_s18 = smov 64   ;;  %s222_s19 = smov 4  }
   0xd   :  { %23 = dma.hbm_to_vmem [thread:$0]  %s278_s0, 128, %s18_s16, [#allocation3], %s221_s18, %s221_s18, %s222_s19  }
   0xe   :  { %s223_s22 = smov [#allocation5]  }
   0xf   :  { %s29_s23 = sshll.u32 %s223_s22, 4  ;;  %s30_s23 = int_to_ptr.vmem [resolvable:$true] %s29_s23 }
  0x10   :  { %s182_s24 = scalar_lea.vmem %s30_s23, 128  ;;  %p187_p6 = scmp.lt.s32.totalorder %s30_s23, %s30_s23 }
  0x11   :  { %p183_p5 = scmp.ne.s32.totalorder %s30_s23, %s182_s24  ;;  %p188_p7 = scmp.lt.s32.totalorder %s182_s24, %s182_s24 }
  0x13   :  { %p189_p8 = por %p188_p7, %p187_p6 }
  0x15   :  { %p190_p9 = pnand %p189_p8, %p183_p5 }
  0x17   :  { %193 = shalt.err (!%p190_p9)
}
  0x18   :  { %35 = dma.hbm_to_vmem [thread:$0]  %s279_s1, 128, %s30_s23, [#allocation6], %s221_s18, %s221_s18, %s222_s19  }
  0x19   :  { %214 = dma.done.wait [#allocation3], 128  }
  0x1a   :  { %215 = vsyncadd [#allocation3], 4294967168 }
  0x1b   :  { %216 = dma.done.wait [#allocation6], 128  }
  0x1c   :  { %217 = vsyncadd [#allocation6], 4294967168  ;;  %v138_v0 = vld [vmem:[#allocation2] sm:$0xff]   ;;  %v142_v1 = vld [vmem:[#allocation5] sm:$0xff]   ;;  %vm56_vm0 = vcmask 261120   ;;  %vm110_vm1 = vcmask 257024  }
  0x1d   :  { %v139_v2 = vunpack.c.l.bf16 %v138_v0  ;;  %v143_v3 = vunpack.c.l.bf16 %v142_v1  ;;  %v140_v4 = vunpack.c.h.bf16 %v138_v0  ;;  %v144_v5 = vunpack.c.h.bf16 %v142_v1  ;;  %v131_v27 = vld [vmem:[%s280_s2] ss:$0 sm:$0xff]  ;;  %s224_s29 = smov [#allocation7]  }
  0x1e   :  { %v132_v29 = vld [vmem:[%s281_s3] ss:$0 sm:$0xff]  ;;  %s118_s30 = sshll.u32 %s224_s29, 4  ;;  %s119_s30 = int_to_ptr.vmem [resolvable:$true] %s118_s30 }
  0x1f   :  { %v54_v6 = vadd.f32 %v143_v3, %v139_v2  ;;  %v55_v7 = vadd.f32 %v144_v5, %v140_v4  ;;  %s194_s2 = scalar_lea.vmem %s119_s30, 128  ;;  %p199_p11 = scmp.lt.s32.totalorder %s119_s30, %s119_s30 }
  0x20   :  { %p195_p10 = scmp.ne.s32.totalorder %s119_s30, %s194_s2  ;;  %p200_p12 = scmp.lt.s32.totalorder %s194_s2, %s194_s2 }
  0x21   :  { %v57_v8 = vsel %vm56_vm0, %v54_v6, 0.0  ;;  %v60_v9 = vsel %vm56_vm0, %v55_v7, 0.0 }
  0x22   :  { %58 = vadd.xlane.f32.xlu0 %v57_v8  ;;  %p201_p13 = por %p200_p12, %p199_p11 }
  0x24   :  { %p202_p0 = pnand %p201_p13, %p195_p10 }
  0x26   :  { %61 = vadd.xlane.f32.xlu0 %v60_v9 }
  0xab   :  { %v59_v10 = vpop.xlane.xlu0 %58 }
  0xac   :  { %v64_v11 = vmul.f32 0.03125, %v59_v10 }
  0xae   :  { %v66_v12 = vsub.f32 %v54_v6, %v64_v11 }
  0xaf   :  { %v62_v13 = vpop.xlane.xlu0 %61 }
  0xb0   :  { %v65_v14 = vmul.f32 0.03125, %v62_v13  ;;  %v68_v15 = vmul.f32 %v66_v12, %v66_v12 }
  0xb2   :  { %v67_v16 = vsub.f32 %v55_v7, %v65_v14  ;;  %v70_v17 = vsel %vm56_vm0, %v68_v15, 0.0 }
  0xb3   :  { %71 = vadd.xlane.f32.xlu1 %v70_v17 }
  0xb4   :  { %v69_v18 = vmul.f32 %v67_v16, %v67_v16 }
  0xb6   :  { %v73_v19 = vsel %vm56_vm0, %v69_v18, 0.0 }
  0xb7   :  { %74 = vadd.xlane.f32.xlu1 %v73_v19 }
 0x13c   :  { %v72_v20 = vpop.xlane.xlu1 %71 }
 0x13d   :  { %v76_v21 = vmul.f32 0.03125, %v72_v20 }
 0x13f   :  { %v78_v22 = vadd.f32 1e-05, %v76_v21 }
 0x140   :  { %v75_v23 = vpop.xlane.xlu1 %74 }
 0x141   :  { %150 = vrsqrt.f32 %v78_v22  ;;  %v77_v24 = vmul.f32 0.03125, %v75_v23 }
 0x143   :  { %v79_v25 = vadd.f32 1e-05, %v77_v24 }
 0x145   :  { %152 = vrsqrt.f32 %v79_v25 }
 0x14e   :  { %v151_v26 = vpop.eup %150 }
 0x14f   :  { %v82_v28 = vmul.f32 %v151_v26, %v66_v12 }
 0x151   :  { %v91_v30 = vmul.f32 %v131_v27, %v82_v28 }
 0x152   :  { %v153_v31 = vpop.eup %152 }
 0x153   :  { %v83_v32 = vmul.f32 %v153_v31, %v67_v16  ;;  %v100_v33 = vadd.f32 %v132_v29, %v91_v30 }
 0x155   :  { %v92_v34 = vmul.f32 %v131_v27, %v83_v32  ;;  %v135_v35 = vpack.c.bf16 %v100_v33, %v100_v33 }
 0x157   :  { %v101_v36 = vadd.f32 %v132_v29, %v92_v34  ;;  %111 = vst.msk [vmem:[#allocation7] sm:$0xf] %vm110_vm1, %v135_v35 }
 0x159   :  { %v136_v37 = vpack.c.bf16 %v101_v36, %v101_v36 }
 0x15b   :  { %112 = vst.msk [vmem:[#allocation7 + $0x4] sm:$0xf] %vm110_vm1, %v136_v37 }
 0x15c   :  { %205 = shalt.err (!%p202_p0)
}
 0x15d   :  { %124 = dma.vmem_to_hbm [thread:$0]  %s119_s30, 128, %s282_s4, [#allocation4], %s221_s18, %s221_s18, %s222_s19  }
 0x15e   :  { %218 = dma.done.wait [#allocation4], 128  }
 0x15f   :  { %219 = vsyncadd [#allocation4], 4294967168 }
 0x160   :  { %128 = vsyncpa [#allocation3], 1 }
 0x161   :  { %129 = vsyncpa [#allocation6], 1 }
 0x162   :  { %130 = vsyncpa [#allocation4], 1 }

</bundles_post_ra>
